<compile_context>
chip_gen: v6e
topology: v6e:2x2x1
jax: 0.10.0
libtpu: 0.0.40
codegen_flags: <defaults>
</compile_context>

<pallas_src>
import jax
import jax.numpy as jnp
from jax import lax
from jax.experimental import pallas as pl
from jax.experimental.pallas import tpu as pltpu

_PAD_SHAPE = (8, 128)  # one f32 vreg tile — minimum legal tile, single store


def _rand_kernel(seed_ref, rand_ref):
    """seed_ref: SMEM (1,) int32; rand_ref: VMEM (8, 128) f32 of uniforms in [0,1)."""
    seed = seed_ref[0].astype(jnp.uint32)

    # Per-element counter: row * 128 + col  (2-D iota is required on TPU).
    row = lax.broadcasted_iota(jnp.int32, _PAD_SHAPE, 0).astype(jnp.uint32)
    col = lax.broadcasted_iota(jnp.int32, _PAD_SHAPE, 1).astype(jnp.uint32)
    x = row * jnp.uint32(_PAD_SHAPE[1]) + col

    # Mix in the seed, then splitmix32-style avalanche (wrapping uint32 math).
    x = x + seed * jnp.uint32(0x9E3779B9)
    x = x ^ (x >> jnp.uint32(16))
    x = x * jnp.uint32(0x7FEB352D)
    x = x ^ (x >> jnp.uint32(15))
    x = x * jnp.uint32(0x846CA68B)
    x = x ^ (x >> jnp.uint32(16))

    # Top 24 bits -> exact float32 in [0, 1).
    top = (x >> jnp.uint32(8)).astype(jnp.int32)  # < 2^24, safe signed convert
    rand_ref[...] = top.astype(jnp.float32) * jnp.float32(1.0 / 16777216.0)


def model_forward(x1, seed=0):
    """Pallas equivalent of Model.forward. Returns (x3, x3)."""
    orig_shape = x1.shape
    n = x1.size
    assert n <= _PAD_SHAPE[0] * _PAD_SHAPE[1], "tiny-input fast path only"

    seed_arr = jnp.array([seed], dtype=jnp.int32)

    rand_pad = pl.pallas_call(
        _rand_kernel,
        out_shape=jax.ShapeDtypeStruct(_PAD_SHAPE, jnp.float32),
        in_specs=[pl.BlockSpec(memory_space=pltpu.MemorySpace.SMEM)],   # seed
        out_specs=pl.BlockSpec(memory_space=pltpu.MemorySpace.VMEM),    # rand slab
    )(seed_arr)

    # Tiny wrapper-side slice/reshape (unavoidable to return x1's shape).
    x3 = rand_pad.reshape(-1)[:n].reshape(orig_shape).astype(x1.dtype)
    return (x3, x3)


if __name__ == "__main__":
    key = jax.random.PRNGKey(0)
    x1 = jax.random.normal(key, (1, 2, 2), dtype=jnp.float32)

    out_a, out_b = model_forward(x1, seed=0)
    jax.block_until_ready((out_a, out_b))

    # Sanity: shape/dtype match x1, both returns identical, values in [0, 1),
    # and not all elements equal (hash actually varies per element).
    assert out_a.shape == x1.shape and out_a.dtype == x1.dtype
    assert bool(jnp.all(out_a == out_b))
    assert bool(jnp.all(out_a >= 0.0)) and bool(jnp.all(out_a < 1.0))
    assert bool(jnp.max(out_a) > jnp.min(out_a))

    print("KERNEL_OK")
</pallas_src>

<mosaic_0001>
module attributes {stable_mosaic.version = 11 : i64} {
  func.func @_rand_kernel(%arg0: memref<1xi32, #tpu.memory_space<smem>>, %arg1: memref<8x128xf32, #tpu.memory_space<vmem>>) attributes {dimension_semantics = [], scalar_prefetch = 0 : i64, scratch_operands = 0 : i64, tpu.core_type = #tpu.core_type<tc>} {
    %c0 = arith.constant 0 : index
    %0 = memref.load %arg0[%c0] : memref<1xi32, #tpu.memory_space<smem>>
    %1 = tpu.iota {dimensions = array<i32: 0>} : vector<8x128xi32>
    %2 = tpu.iota {dimensions = array<i32: 1>} : vector<8x128xi32>
    %c128_i32 = arith.constant 128 : i32
    %3 = vector.broadcast %c128_i32 : i32 to vector<8x128xi32>
    %4 = arith.muli %1, %3 : vector<8x128xi32>
    %5 = arith.addi %4, %2 : vector<8x128xi32>
    %c-1640531527_i32 = arith.constant -1640531527 : i32
    %6 = arith.muli %0, %c-1640531527_i32 : i32
    %7 = vector.broadcast %6 : i32 to vector<8x128xi32>
    %8 = arith.addi %5, %7 : vector<8x128xi32>
    %c16_i32 = arith.constant 16 : i32
    %9 = vector.broadcast %c16_i32 : i32 to vector<8x128xi32>
    %10 = arith.shrui %8, %9 : vector<8x128xi32>
    %11 = arith.xori %8, %10 : vector<8x128xi32>
    %c2146121005_i32 = arith.constant 2146121005 : i32
    %12 = vector.broadcast %c2146121005_i32 : i32 to vector<8x128xi32>
    %13 = arith.muli %11, %12 : vector<8x128xi32>
    %c15_i32 = arith.constant 15 : i32
    %14 = vector.broadcast %c15_i32 : i32 to vector<8x128xi32>
    %15 = arith.shrui %13, %14 : vector<8x128xi32>
    %16 = arith.xori %13, %15 : vector<8x128xi32>
    %c-2073254261_i32 = arith.constant -2073254261 : i32
    %17 = vector.broadcast %c-2073254261_i32 : i32 to vector<8x128xi32>
    %18 = arith.muli %16, %17 : vector<8x128xi32>
    %c16_i32_0 = arith.constant 16 : i32
    %19 = vector.broadcast %c16_i32_0 : i32 to vector<8x128xi32>
    %20 = arith.shrui %18, %19 : vector<8x128xi32>
    %21 = arith.xori %18, %20 : vector<8x128xi32>
    %c8_i32 = arith.constant 8 : i32
    %22 = vector.broadcast %c8_i32 : i32 to vector<8x128xi32>
    %23 = arith.shrui %21, %22 : vector<8x128xi32>
    %24 = arith.sitofp %23 : vector<8x128xi32> to vector<8x128xf32>
    %cst = arith.constant 5.96046448E-8 : f32
    %25 = vector.broadcast %cst : f32 to vector<8x128xf32>
    %26 = arith.mulf %24, %25 : vector<8x128xf32>
    %c0_1 = arith.constant 0 : index
    %c0_2 = arith.constant 0 : index
    %27 = vector.load %arg1[%c0_1, %c0_2] : memref<8x128xf32, #tpu.memory_space<vmem>>, vector<8x128xf32>
    tpu.vector_store %arg1[%c0_1, %c0_2], %26 {strides = array<i32>} : memref<8x128xf32, #tpu.memory_space<vmem>>, vector<8x128xf32>,
    return
  }
}

</mosaic_0001>

<bundles_post_ra>
// kernel: tpu_custom_call.1
= control target key start
LH: loop header
LB: loop body
LE: loop exit
PB: predicated region body
PF: predicated region fallthrough
CT: control target
= control target key end

     0   :  { %v11_v0 = vlaneseq  ;;  %s86_s0 = inlined_call_operand.<no memory space> [shape: s32[1], index: 0, kind: input, shape index: {}]   ;;  %s87_s1 = inlined_call_operand.hbm [shape: f32[8,128], index: 1, kind: output, shape index: {}]  }
   0x1   :  { %7 = vsyncpa [#allocation4], 0  ;;  %s17_s8 = smul.u32 2654435769, %s86_s0  ;;  %s69_s9 = smov [#allocation3]  }
   0x2   :  { %v12_v1 = vshrl.u32 %v11_v0, 7  ;;  %v14_v2 = vand.u32 127, %v11_v0  ;;  %s38_s10 = sshll.u32 %s69_s9, 4  ;;  %s39_s10 = int_to_ptr.vmem [resolvable:$true] %s38_s10 }
   0x3   :  { %v18_v4 = vstv %s17_s8  ;;  %s47_s0 = scalar_lea.vmem %s39_s10, 128  ;;  %p52_p1 = scmp.lt.s32.totalorder %s39_s10, %s39_s10 }
   0x4   :  { %v15_v3 = vmul.u32 128, %v12_v1  ;;  %p48_p0 = scmp.ne.s32.totalorder %s39_s10, %s47_s0  ;;  %p53_p2 = scmp.lt.s32.totalorder %s47_s0, %s47_s0 }
   0x6   :  { %v16_v5 = vadd.s32 %v15_v3, %v14_v2  ;;  %p54_p3 = por %p53_p2, %p52_p1 }
   0x8   :  { %v19_v6 = vadd.s32 %v18_v4, %v16_v5  ;;  %p55_p4 = pnand %p54_p3, %p48_p0 }
   0xa   :  { %v20_v7 = vshrl.u32 %v19_v6, 16 }
   0xc   :  { %v21_v8 = vxor.u32 %v20_v7, %v19_v6 }
   0xe   :  { %v22_v9 = vmul.u32 2146121005, %v21_v8 }
  0x10   :  { %v23_v10 = vshrl.u32 %v22_v9, 15 }
  0x12   :  { %v24_v11 = vxor.u32 %v23_v10, %v22_v9 }
  0x14   :  { %v25_v12 = vmul.u32 2221713035, %v24_v11 }
  0x16   :  { %v26_v13 = vshrl.u32 %v25_v12, 16 }
  0x18   :  { %v27_v14 = vxor.u32 %v26_v13, %v25_v12 }
  0x1a   :  { %v28_v15 = vshrl.u32 %v27_v14, 8 }
  0x1c   :  { %v29_v16 = vcvt.s32.f32 %v28_v15 }
  0x1e   :  { %v30_v17 = vmul.f32 5.9604645e-08, %v29_v16 }
  0x20   :  { %31 = vst [vmem:[#allocation3] sm:$0xff] %v30_v17 }
  0x21   :  { %58 = shalt.err (!%p55_p4)
}
  0x22   :  { %41 = dma.vmem_to_hbm [thread:$0]  %s39_s10, 128, %s87_s1, [#allocation4]  }
  0x23   :  { %67 = dma.done.wait [#allocation4], 128  }
  0x24   :  { %68 = vsyncadd [#allocation4], 4294967168 }
  0x25   :  { %45 = vsyncpa [#allocation4], 1 }

</bundles_post_ra>
